<compile_context>
chip_gen: v5e
topology: v5e:2x2
jax: 0.10.0
libtpu: 0.0.40
codegen_flags: <defaults>
</compile_context>

<pallas_src>
import functools

import jax
import jax.numpy as jnp
from jax.experimental import pallas as pl
from jax.experimental.pallas import tpu as pltpu

BN_EPS = 1e-5   # nn.BatchNorm2d default
LN_EPS = 1e-5   # ClassifierHead norm_eps default


def _hardswish(x):
    return x * jnp.clip(x + 3.0, 0.0, 6.0) * (1.0 / 6.0)


# --------------------------- fused Pallas kernel -----------------------------

def _head_kernel(x_ref, w1_ref, s1_ref, w2_ref, lng_ref, lnb_ref, w3_ref, b3_ref,
                 o_ref, *, inv_hw, ln_eps):
    """Whole ClassifierHead for one batch element, all intermediates in VMEM."""
    # --- in_conv: 1x1 conv with BN folded into (w1, s1), then Hardswish -----
    x = x_ref[...].astype(jnp.bfloat16)                               # (HW, Cin)
    h = jnp.dot(x, w1_ref[...], preferred_element_type=jnp.float32)   # (HW, W0)
    h = _hardswish(h + s1_ref[...])                                   # f32 epilogue

    # --- global average pool over spatial positions --------------------------
    pooled = jnp.sum(h, axis=0, keepdims=True) * inv_hw               # (1, W0)

    # --- Linear(W0 -> W1, bias=False) ----------------------------------------
    z = jnp.dot(pooled.astype(jnp.bfloat16), w2_ref[...],
                preferred_element_type=jnp.float32)                   # (1, W1)

    # --- LayerNorm(W1) + Hardswish -------------------------------------------
    mu = jnp.mean(z, axis=-1, keepdims=True)
    zc = z - mu
    var = jnp.mean(zc * zc, axis=-1, keepdims=True)
    z = zc * jax.lax.rsqrt(var + ln_eps)                              # EUP rsqrt
    z = _hardswish(z * lng_ref[...] + lnb_ref[...])

    # --- Linear(W1 -> num_classes, bias=True) --------------------------------
    out = jnp.dot(z.astype(jnp.bfloat16), w3_ref[...],
                  preferred_element_type=jnp.float32) + b3_ref[...]   # (1, NC)
    o_ref[0] = out.astype(o_ref.dtype)


# --------------------------- wrapper ------------------------------------------

def classifier_head_forward(x_nhwc, params):
    """x_nhwc: (B, H, W, Cin) float32 -> logits (B, num_classes) float32."""
    B, H, W, Cin = x_nhwc.shape
    HW = H * W

    # Fold BatchNorm (eval mode) into the 1x1 conv weight + per-channel shift.
    bn = params["conv_bn"]
    scale = bn["gamma"] * jax.lax.rsqrt(bn["var"] + BN_EPS)
    w1 = (params["conv_w"] * scale[None, :]).astype(jnp.bfloat16)     # (Cin, W0)
    shift = (bn["beta"] - bn["mean"] * scale).astype(jnp.float32)     # (W0,)
    W0 = w1.shape[1]

    w2 = params["fc1_w"].astype(jnp.bfloat16)                         # (W0, W1)
    W1dim = w2.shape[1]
    lng = params["ln_gamma"].astype(jnp.float32)
    lnb = params["ln_beta"].astype(jnp.float32)
    w3 = params["fc2_w"].astype(jnp.bfloat16)                         # (W1, NC)
    b3 = params["fc2_b"].astype(jnp.float32)
    NC = w3.shape[1]

    x2 = x_nhwc.reshape(B * HW, Cin)                                  # NHWC flatten
    kern = functools.partial(_head_kernel, inv_hw=1.0 / HW, ln_eps=LN_EPS)

    out = pl.pallas_call(
        kern,
        out_shape=jax.ShapeDtypeStruct((B, 1, NC), jnp.float32),
        grid=(B,),
        in_specs=[
            pl.BlockSpec((HW, Cin), lambda b: (b, 0)),        # per-batch activations
            pl.BlockSpec((Cin, W0), lambda b: (0, 0)),        # folded conv weight
            pl.BlockSpec((1, W0), lambda b: (0, 0)),          # folded BN shift
            pl.BlockSpec((W0, W1dim), lambda b: (0, 0)),      # fc1 weight
            pl.BlockSpec((1, W1dim), lambda b: (0, 0)),       # LN gamma
            pl.BlockSpec((1, W1dim), lambda b: (0, 0)),       # LN beta
            pl.BlockSpec((W1dim, NC), lambda b: (0, 0)),      # fc2 weight
            pl.BlockSpec((1, NC), lambda b: (0, 0)),          # fc2 bias
        ],
        out_specs=pl.BlockSpec((1, 1, NC), lambda b: (b, 0, 0)),
        compiler_params=pltpu.CompilerParams(
            dimension_semantics=("parallel",)),               # v7x: 2 TCs split batch
    )(x2, w1, shift.reshape(1, W0), w2, lng.reshape(1, W1dim),
      lnb.reshape(1, W1dim), w3, b3.reshape(1, NC))
    return out.reshape(B, NC)


# --------------------------- pure-JAX reference (f32) -------------------------

def classifier_head_reference(x_nhwc, params):
    B, H, W, Cin = x_nhwc.shape
    bn = params["conv_bn"]
    scale = bn["gamma"] / jnp.sqrt(bn["var"] + BN_EPS)
    shift = bn["beta"] - bn["mean"] * scale
    h = x_nhwc.reshape(B, H * W, Cin) @ params["conv_w"]     # 1x1 conv (no bias)
    h = _hardswish(h * scale + shift)                        # BN (eval) + act
    pooled = jnp.mean(h, axis=1)                             # global avg pool
    z = pooled @ params["fc1_w"]                             # Linear no bias
    mu = jnp.mean(z, axis=-1, keepdims=True)
    var = jnp.mean((z - mu) ** 2, axis=-1, keepdims=True)
    z = (z - mu) / jnp.sqrt(var + LN_EPS)
    z = _hardswish(z * params["ln_gamma"] + params["ln_beta"])
    return z @ params["fc2_w"] + params["fc2_b"]             # Linear with bias


# --------------------------- params / main -------------------------------------

def init_params(key, in_chs, widths, num_classes):
    keys = iter(jax.random.split(key, 16))

    def rnd(shape, fan_in):
        return jax.random.normal(next(keys), shape, jnp.float32) / jnp.sqrt(fan_in)

    W0, W1 = widths
    return dict(
        conv_w=rnd((in_chs, W0), in_chs),
        conv_bn=dict(
            gamma=1.0 + 0.1 * jax.random.normal(next(keys), (W0,), jnp.float32),
            beta=0.1 * jax.random.normal(next(keys), (W0,), jnp.float32),
            mean=0.1 * jax.random.normal(next(keys), (W0,), jnp.float32),
            var=1.0 + 0.1 * jnp.abs(jax.random.normal(next(keys), (W0,), jnp.float32)),
        ),
        fc1_w=rnd((W0, W1), W0),
        ln_gamma=1.0 + 0.1 * jax.random.normal(next(keys), (W1,), jnp.float32),
        ln_beta=0.1 * jax.random.normal(next(keys), (W1,), jnp.float32),
        fc2_w=rnd((W1, num_classes), W1),
        fc2_b=0.1 * jax.random.normal(next(keys), (num_classes,), jnp.float32),
    )


if __name__ == "__main__":
    key = jax.random.PRNGKey(0)
    pkey, xkey = jax.random.split(key)

    # Small config (lane-dense widths): in_channels=64, widths=[128, 256],
    # num_classes=128, input (2, 16, 16, 64) NHWC  (torch NCHW: (2, 64, 16, 16)).
    IN_CHS, WIDTHS, NUM_CLASSES = 64, (128, 256), 128
    B, H, W = 2, 16, 16

    params = init_params(pkey, IN_CHS, WIDTHS, NUM_CLASSES)
    x = jax.random.normal(xkey, (B, H, W, IN_CHS), jnp.float32)

    out = jax.block_until_ready(classifier_head_forward(x, params))
    assert out.shape == (B, NUM_CLASSES), out.shape
    assert bool(jnp.all(jnp.isfinite(out)))

    ref = classifier_head_reference(x, params)
    err = float(jnp.max(jnp.abs(out - ref)))
    # bf16 MXU operands vs. f32 reference: allow a loose absolute tolerance.
    assert err < 1e-1, f"max abs err vs f32 reference: {err}"

    print("KERNEL_OK")
</pallas_src>

<mosaic_0001>
module attributes {stable_mosaic.version = 11 : i64} {
  func.func @_head_kernel(%arg0: i32, %arg1: memref<256x64xf32, #tpu.memory_space<vmem>>, %arg2: memref<64x128xbf16, #tpu.memory_space<vmem>>, %arg3: memref<1x128xf32, #tpu.memory_space<vmem>>, %arg4: memref<128x256xbf16, #tpu.memory_space<vmem>>, %arg5: memref<1x256xf32, #tpu.memory_space<vmem>>, %arg6: memref<1x256xf32, #tpu.memory_space<vmem>>, %arg7: memref<256x128xbf16, #tpu.memory_space<vmem>>, %arg8: memref<1x128xf32, #tpu.memory_space<vmem>>, %arg9: memref<1x1x128xf32, #tpu.memory_space<vmem>>) attributes {dimension_semantics = [#tpu.dimension_semantics<parallel>], iteration_bounds = array<i64: 2>, scalar_prefetch = 0 : i64, scratch_operands = 0 : i64, tpu.core_type = #tpu.core_type<tc>, window_params = [{transform_indices = @transform_0, window_bounds = array<i64: 256, 64>}, {pipeline_mode = #tpu.pipeline_mode<synchronous>, transform_indices = @transform_1, window_bounds = array<i64: 64, 128>}, {pipeline_mode = #tpu.pipeline_mode<synchronous>, transform_indices = @transform_2, window_bounds = array<i64: 1, 128>}, {pipeline_mode = #tpu.pipeline_mode<synchronous>, transform_indices = @transform_3, window_bounds = array<i64: 128, 256>}, {pipeline_mode = #tpu.pipeline_mode<synchronous>, transform_indices = @transform_4, window_bounds = array<i64: 1, 256>}, {pipeline_mode = #tpu.pipeline_mode<synchronous>, transform_indices = @transform_5, window_bounds = array<i64: 1, 256>}, {pipeline_mode = #tpu.pipeline_mode<synchronous>, transform_indices = @transform_6, window_bounds = array<i64: 256, 128>}, {pipeline_mode = #tpu.pipeline_mode<synchronous>, transform_indices = @transform_7, window_bounds = array<i64: 1, 128>}, {transform_indices = @transform_8, window_bounds = array<i64: 1, 1, 128>}]} {
    %c0 = arith.constant 0 : index
    %c0_0 = arith.constant 0 : index
    %0 = vector.load %arg1[%c0, %c0_0] : memref<256x64xf32, #tpu.memory_space<vmem>>, vector<256x64xf32>
    %1 = arith.truncf %0 : vector<256x64xf32> to vector<256x64xbf16>
    %c0_1 = arith.constant 0 : index
    %c0_2 = arith.constant 0 : index
    %2 = vector.load %arg2[%c0_1, %c0_2] : memref<64x128xbf16, #tpu.memory_space<vmem>>, vector<64x128xbf16>
    %cst = arith.constant dense<0.000000e+00> : vector<256x128xf32>
    %3 = tpu.matmul %1, %2, %cst {dimension_numbers = #tpu.dot_dimension_numbers<[1], [0], [0], [1], [0, 0, 1, 1], [], []>} : vector<256x64xbf16>, vector<64x128xbf16>, vector<256x128xf32> -> vector<256x128xf32>
    %c0_3 = arith.constant 0 : index
    %c0_4 = arith.constant 0 : index
    %4 = vector.load %arg3[%c0_3, %c0_4] : memref<1x128xf32, #tpu.memory_space<vmem>>, vector<1x128xf32>
    %5 = vector.broadcast %4 : vector<1x128xf32> to vector<256x128xf32>
    %6 = arith.addf %3, %5 : vector<256x128xf32>
    %cst_5 = arith.constant 3.000000e+00 : f32
    %7 = vector.broadcast %cst_5 : f32 to vector<256x128xf32>
    %8 = arith.addf %6, %7 : vector<256x128xf32>
    %cst_6 = arith.constant 0.000000e+00 : f32
    %cst_7 = arith.constant 6.000000e+00 : f32
    %9 = vector.broadcast %cst_6 : f32 to vector<256x128xf32>
    %10 = arith.maximumf %9, %8 : vector<256x128xf32>
    %11 = vector.broadcast %cst_7 : f32 to vector<256x128xf32>
    %12 = arith.minimumf %11, %10 : vector<256x128xf32>
    %13 = arith.mulf %6, %12 : vector<256x128xf32>
    %cst_8 = arith.constant 0.166666672 : f32
    %14 = vector.broadcast %cst_8 : f32 to vector<256x128xf32>
    %15 = arith.mulf %13, %14 : vector<256x128xf32>
    %cst_9 = arith.constant dense<0.000000e+00> : vector<128xf32>
    %16 = vector.multi_reduction <add>, %15, %cst_9 [0] : vector<256x128xf32> to vector<128xf32>
    %17 = vector.shape_cast %16 : vector<128xf32> to vector<1x128xf32>
    %cst_10 = arith.constant 3.906250e-03 : f32
    %18 = vector.broadcast %cst_10 : f32 to vector<1x128xf32>
    %19 = arith.mulf %17, %18 : vector<1x128xf32>
    %20 = arith.truncf %19 : vector<1x128xf32> to vector<1x128xbf16>
    %c0_11 = arith.constant 0 : index
    %c0_12 = arith.constant 0 : index
    %21 = vector.load %arg4[%c0_11, %c0_12] : memref<128x256xbf16, #tpu.memory_space<vmem>>, vector<128x256xbf16>
    %cst_13 = arith.constant dense<0.000000e+00> : vector<1x256xf32>
    %22 = tpu.matmul %20, %21, %cst_13 {dimension_numbers = #tpu.dot_dimension_numbers<[1], [0], [0], [1], [0, 0, 1, 1], [], []>} : vector<1x128xbf16>, vector<128x256xbf16>, vector<1x256xf32> -> vector<1x256xf32>
    %cst_14 = arith.constant dense<0.000000e+00> : vector<1xf32>
    %23 = vector.multi_reduction <add>, %22, %cst_14 [1] : vector<1x256xf32> to vector<1xf32>
    %24 = vector.shape_cast %23 : vector<1xf32> to vector<1x1xf32>
    %cst_15 = arith.constant 2.560000e+02 : f32
    %25 = vector.broadcast %cst_15 : f32 to vector<1x1xf32>
    %26 = arith.divf %24, %25 : vector<1x1xf32>
    %27 = vector.broadcast %26 : vector<1x1xf32> to vector<1x256xf32>
    %28 = arith.subf %22, %27 : vector<1x256xf32>
    %29 = arith.mulf %28, %28 : vector<1x256xf32>
    %cst_16 = arith.constant dense<0.000000e+00> : vector<1xf32>
    %30 = vector.multi_reduction <add>, %29, %cst_16 [1] : vector<1x256xf32> to vector<1xf32>
    %31 = vector.shape_cast %30 : vector<1xf32> to vector<1x1xf32>
    %cst_17 = arith.constant 2.560000e+02 : f32
    %32 = vector.broadcast %cst_17 : f32 to vector<1x1xf32>
    %33 = arith.divf %31, %32 : vector<1x1xf32>
    %cst_18 = arith.constant 9.99999974E-6 : f32
    %34 = vector.broadcast %cst_18 : f32 to vector<1x1xf32>
    %35 = arith.addf %33, %34 : vector<1x1xf32>
    %36 = math.rsqrt %35 : vector<1x1xf32>
    %37 = vector.broadcast %36 : vector<1x1xf32> to vector<1x256xf32>
    %38 = arith.mulf %28, %37 : vector<1x256xf32>
    %c0_19 = arith.constant 0 : index
    %c0_20 = arith.constant 0 : index
    %39 = vector.load %arg5[%c0_19, %c0_20] : memref<1x256xf32, #tpu.memory_space<vmem>>, vector<1x256xf32>
    %40 = arith.mulf %38, %39 : vector<1x256xf32>
    %c0_21 = arith.constant 0 : index
    %c0_22 = arith.constant 0 : index
    %41 = vector.load %arg6[%c0_21, %c0_22] : memref<1x256xf32, #tpu.memory_space<vmem>>, vector<1x256xf32>
    %42 = arith.addf %40, %41 : vector<1x256xf32>
    %cst_23 = arith.constant 3.000000e+00 : f32
    %43 = vector.broadcast %cst_23 : f32 to vector<1x256xf32>
    %44 = arith.addf %42, %43 : vector<1x256xf32>
    %cst_24 = arith.constant 0.000000e+00 : f32
    %cst_25 = arith.constant 6.000000e+00 : f32
    %45 = vector.broadcast %cst_24 : f32 to vector<1x256xf32>
    %46 = arith.maximumf %45, %44 : vector<1x256xf32>
    %47 = vector.broadcast %cst_25 : f32 to vector<1x256xf32>
    %48 = arith.minimumf %47, %46 : vector<1x256xf32>
    %49 = arith.mulf %42, %48 : vector<1x256xf32>
    %cst_26 = arith.constant 0.166666672 : f32
    %50 = vector.broadcast %cst_26 : f32 to vector<1x256xf32>
    %51 = arith.mulf %49, %50 : vector<1x256xf32>
    %52 = arith.truncf %51 : vector<1x256xf32> to vector<1x256xbf16>
    %c0_27 = arith.constant 0 : index
    %c0_28 = arith.constant 0 : index
    %53 = vector.load %arg7[%c0_27, %c0_28] : memref<256x128xbf16, #tpu.memory_space<vmem>>, vector<256x128xbf16>
    %cst_29 = arith.constant dense<0.000000e+00> : vector<1x128xf32>
    %54 = tpu.matmul %52, %53, %cst_29 {dimension_numbers = #tpu.dot_dimension_numbers<[1], [0], [0], [1], [0, 0, 1, 1], [], []>} : vector<1x256xbf16>, vector<256x128xbf16>, vector<1x128xf32> -> vector<1x128xf32>
    %c0_30 = arith.constant 0 : index
    %c0_31 = arith.constant 0 : index
    %55 = vector.load %arg8[%c0_30, %c0_31] : memref<1x128xf32, #tpu.memory_space<vmem>>, vector<1x128xf32>
    %56 = arith.addf %54, %55 : vector<1x128xf32>
    %c0_32 = arith.constant 0 : index
    %c0_33 = arith.constant 0 : index
    %c0_34 = arith.constant 0 : index
    %57 = vector.load %arg9[%c0_32, %c0_33, %c0_34] : memref<1x1x128xf32, #tpu.memory_space<vmem>>, vector<1x1x128xf32>
    %58 = vector.shape_cast %57 : vector<1x1x128xf32> to vector<1x128xf32>
    %59 = vector.shape_cast %56 : vector<1x128xf32> to vector<1x1x128xf32>
    tpu.vector_store %arg9[%c0_32, %c0_33, %c0_34], %59 {strides = array<i32>} : memref<1x1x128xf32, #tpu.memory_space<vmem>>, vector<1x1x128xf32>,
    return
  }
  func.func @transform_0(%arg0: i32) -> (i32, i32) {
    %c0_i32 = arith.constant 0 : i32
    %c0_i32_0 = arith.constant 0 : i32
    return %arg0, %c0_i32 : i32, i32
  }
  func.func @transform_1(%arg0: i32) -> (i32, i32) {
    %c0_i32 = arith.constant 0 : i32
    %c0_i32_0 = arith.constant 0 : i32
    %c0_i32_1 = arith.constant 0 : i32
    return %c0_i32, %c0_i32_0 : i32, i32
  }
  func.func @transform_2(%arg0: i32) -> (i32, i32) {
    %c0_i32 = arith.constant 0 : i32
    %c0_i32_0 = arith.constant 0 : i32
    %c0_i32_1 = arith.constant 0 : i32
    return %c0_i32, %c0_i32_0 : i32, i32
  }
  func.func @transform_3(%arg0: i32) -> (i32, i32) {
    %c0_i32 = arith.constant 0 : i32
    %c0_i32_0 = arith.constant 0 : i32
    %c0_i32_1 = arith.constant 0 : i32
    return %c0_i32, %c0_i32_0 : i32, i32
  }
  func.func @transform_4(%arg0: i32) -> (i32, i32) {
    %c0_i32 = arith.constant 0 : i32
    %c0_i32_0 = arith.constant 0 : i32
    %c0_i32_1 = arith.constant 0 : i32
    return %c0_i32, %c0_i32_0 : i32, i32
  }
  func.func @transform_5(%arg0: i32) -> (i32, i32) {
    %c0_i32 = arith.constant 0 : i32
    %c0_i32_0 = arith.constant 0 : i32
    %c0_i32_1 = arith.constant 0 : i32
    return %c0_i32, %c0_i32_0 : i32, i32
  }
  func.func @transform_6(%arg0: i32) -> (i32, i32) {
    %c0_i32 = arith.constant 0 : i32
    %c0_i32_0 = arith.constant 0 : i32
    %c0_i32_1 = arith.constant 0 : i32
    return %c0_i32, %c0_i32_0 : i32, i32
  }
  func.func @transform_7(%arg0: i32) -> (i32, i32) {
    %c0_i32 = arith.constant 0 : i32
    %c0_i32_0 = arith.constant 0 : i32
    %c0_i32_1 = arith.constant 0 : i32
    return %c0_i32, %c0_i32_0 : i32, i32
  }
  func.func @transform_8(%arg0: i32) -> (i32, i32, i32) {
    %c0_i32 = arith.constant 0 : i32
    %c0_i32_0 = arith.constant 0 : i32
    %c0_i32_1 = arith.constant 0 : i32
    return %arg0, %c0_i32, %c0_i32_0 : i32, i32, i32
  }
}

</mosaic_0001>

<bundles_post_ra>
// kernel: tpu_custom_call.1
= control target key start
LH: loop header
LB: loop body
LE: loop exit
PB: predicated region body
PF: predicated region fallthrough
CT: control target
= control target key end

     0   :  { %13 = vsyncpa [#allocation3], 0  ;;  %s1961_s0 = inlined_call_operand.vmem [shape: f32[512,64], index: 0, kind: input, shape index: {}]   ;;  %s1962_s1 = inlined_call_operand.vmem [shape: bf16[64,128], index: 1, kind: input, shape index: {}]   ;;  %s1963_s2 = inlined_call_operand.vmem [shape: f32[1,128], index: 2, kind: input, shape index: {}]   ;;  %s1964_s3 = inlined_call_operand.vmem [shape: bf16[128,256], index: 3, kind: input, shape index: {}]   ;;  %s1965_s4 = inlined_call_operand.vmem [shape: f32[1,256], index: 4, kind: input, shape index: {}]   ;;  %s1966_s5 = inlined_call_operand.vmem [shape: f32[1,256], index: 5, kind: input, shape index: {}]   ;;  %s1967_s6 = inlined_call_operand.vmem [shape: bf16[256,128], index: 6, kind: input, shape index: {}]   ;;  %s1968_s7 = inlined_call_operand.vmem [shape: f32[1,128], index: 7, kind: input, shape index: {}]   ;;  %s1969_s8 = inlined_call_operand.hbm [shape: f32[2,1,128], index: 8, kind: output, shape index: {}]  }
   0x1   :  { %15 = vsyncpa [#allocation3 + $0x1], 0  ;;  %s1505_s27 = smov 0   ;;  %s1507_s28 = smov 0  }
   0x2   :  { %s1509_s29 = smov 0   ;;  %s1511_s30 = smov 0  }
   0x3 LB: > { %s1526_s9 = sadd.s32 4294967295, %s1457_s30   ;;  %s1138_s10 = sadd.s32 4294967294, %s1457_s30   ;;  %s1457_s30 = sphi %s1511_s30, %s1975_s30   ;;  %s1453_s29 = sphi %s1509_s29, %s1974_s29   ;;  %s1449_s28 = sphi %s1507_s28, %s1973_s28   ;;  %s1445_s27 = sphi %s1505_s27, %s1972_s27  }
   0x4   : > { %s1530_s11 = sadd.s32 1, %s1457_s30   ;;  %s201_s12 = sadd.s32 1, %s1453_s29 }
   0x5   : > { %s198_s13 = ssub.s32 %s1457_s30, %s1530_s11  ;;  %p211_p0 = scmp.ne.s32.totalorder %s1453_s29, %s1449_s28 }
   0x6   : > { %p199_p1 = scmp.eq.s32.totalorder %s198_s13, 0  ;;  %p212_p2 = scmp.eq.s32.totalorder %s1526_s9, 1 }
   0x7   : > { %p217_p3 = scmp.ne.s32.totalorder %s1449_s28, %s1445_s27  ;;  %p218_p4 = scmp.eq.s32.totalorder %s1138_s10, 1 }
   0x8   : > { %s1541_s14 = scalar_select %p199_p1, %s1453_s29, %s201_s12  }
   0x9   : > { %p1543_p5 = por %p212_p2, %p211_p0  ;;  %p1547_p6 = por %p218_p4, %p217_p3 }
   0xa   : > { %p1141_p7 = scmp.ge.s32.totalorder %s1457_s30, 1  ;;  %p266_p8 = scmp.lt.s32.totalorder %s1457_s30, 3 }
   0xc   : > { %p267_p9 = pnand %p1141_p7, %p266_p8 }
   0xd   : > { %s1142_s19 = sshll.u32 (!%p267_p9), %s1526_s9, 5  ;;  %s297_s12 = sand.u32 (!%p267_p9), 1, %s1449_s28  }
   0xe   : > { %270 = sbr.rel (%p267_p9) target bundleno = 875 (0x36b), region = 52  ;;  %p300_p10 = scmp.lt.s32.totalorder (!%p267_p9), %s1142_s19, 63 }
   0xf   : > { %s1079_s18 = scalar_lea.hbm (!%p267_p9), %s1969_s8, %s1526_s9  ;;  %s298_s21 = scalar_lea.vmem (!%p267_p9), [#allocation2], %s297_s12 }
  0x10   : > { %s1083_s23 = sshll.u32 (!%p267_p9), %s1079_s18, 4  ;;  %s1071_s24 = scalar_lea.sflag (!%p267_p9), [#allocation3], %s297_s12  ;;  %s1084_s23 = int_to_ptr.hbm [resolvable:$true] %s1083_s23 }
  0x11   : > { %s1409_s25 = sshra.s32 (!%p267_p9), %s1084_s23, 4  ;;  %s1415_s13 = scalar_lea.hbm (!%p267_p9), %s1969_s8, 2  ;;  %s1410_s25 = int_to_ptr.hbm [resolvable:$true] %s1409_s25 }
  0x12   : > { %s1411_s26 = scalar_lea.hbm (!%p267_p9), %s1410_s25, 1  ;;  %p1416_p0 = scmp.lt.s32.totalorder (!%p267_p9), %s1410_s25, %s1969_s8 }
  0x13   : > { %v1309_v0 = vld [vmem:[%s1962_s1 + $0x18] sm:$0xff]  ;;  %v1308_v1 = vld [vmem:[%s1962_s1 + $0x10] sm:$0xff]  ;;  %s1977_s19 = smov (!%p300_p10, %s1142_s19), 63  ;;  %v1307_v2 = vld [vmem:[%s1962_s1 + $0x8] sm:$0xff]  ;;  %vm390_vm0 = vcmask 523264   ;;  %vm849_vm1 = vcmask 1040384   ;;  %p1412_p11 = scmp.ne.s32.totalorder %s1410_s25, %s1411_s26 }
  0x14   : > { %443 = vmatpush.bf16.msra.mxu0 %v1309_v0  ;;  %1342 = vmatpush.bf16.msra.mxu2 %v1309_v0  ;;  %s1143_s22 = sshll.u32 %s1977_s19, 3  ;;  %v1306_v3 = vld [vmem:[%s1962_s1] sm:$0xff]  ;;  %p1417_p1 = scmp.lt.s32.totalorder %s1415_s13, %s1411_s26 }
  0x15   : > { %1343 = vmatpush.bf16.msra.mxu3 %v1309_v0  ;;  %s1566_s10 = scalar_lea.vmem %s1961_s0, %s1143_s22  ;;  %s1081_s22 = sshll.u32 %s298_s21, 4  ;;  %s1082_s22 = int_to_ptr.vmem [resolvable:$true] %s1081_s22 }
  0x16   : > { %v306_v4 = vld [vmem:[%s1566_s10] sm:$0xff]  ;;  %v307_v5 = vld [vmem:[%s1566_s10 + $0x8] sm:$0xff]  ;;  %v328_v10 = vld [vmem:[%s1566_s10 + $0xb0] sm:$0xff]  ;;  %p1413_p12 = pnand %p1412_p11, %p1543_p5  ;;  %p1418_p2 = por %p1417_p1, %p1416_p0 }
  0x17   : > { %v318_v6 = vld [vmem:[%s1566_s10 + $0x60] sm:$0xff]  ;;  %v319_v7 = vld [vmem:[%s1566_s10 + $0x68] sm:$0xff]  ;;  %v338_v8 = vpack.c.bf16 %v307_v5, %v306_v4  ;;  %v329_v11 = vld [vmem:[%s1566_s10 + $0xb8] sm:$0xff] }
  0x18   : > { %444 = vmatpush.bf16.msra.mxu0 %v1308_v1  ;;  %1344 = vmatpush.bf16.msra.mxu2 %v1308_v1  ;;  %v344_v9 = vpack.c.bf16 %v319_v7, %v318_v6  ;;  %v349_v12 = vpack.c.bf16 %v329_v11, %v328_v10  ;;  %v308_v13 = vld [vmem:[%s1566_s10 + $0x10] sm:$0xff]  ;;  %v309_v14 = vld [vmem:[%s1566_s10 + $0x18] sm:$0xff]  ;;  %v330_v19 = vld [vmem:[%s1566_s10 + $0xc0] sm:$0xff]  ;;  %p1414_p13 = pneg %p1413_p12 }
  0x19   : > { %1345 = vmatpush.bf16.msra.mxu3 %v1308_v1  ;;  %v320_v15 = vld [vmem:[%s1566_s10 + $0x70] sm:$0xff]  ;;  %v321_v16 = vld [vmem:[%s1566_s10 + $0x78] sm:$0xff]  ;;  %v339_v17 = vpack.c.bf16 %v309_v14, %v308_v13  ;;  %v331_v20 = vld [vmem:[%s1566_s10 + $0xc8] sm:$0xff] }
  0x1a   : > { %v345_v18 = vpack.c.bf16 %v321_v16, %v320_v15  ;;  %v350_v21 = vpack.c.bf16 %v331_v20, %v330_v19  ;;  %v310_v22 = vld [vmem:[%s1566_s10 + $0x20] sm:$0xff]  ;;  %v311_v23 = vld [vmem:[%s1566_s10 + $0x28] sm:$0xff]  ;;  %v332_v28 = vld [vmem:[%s1566_s10 + $0xd0] sm:$0xff]  ;;  %p1419_p3 = pnand %p1418_p2, %p1414_p13 }
  0x1b   : > { %v322_v24 = vld [vmem:[%s1566_s10 + $0x80] sm:$0xff]  ;;  %v323_v25 = vld [vmem:[%s1566_s10 + $0x88] sm:$0xff]  ;;  %v340_v26 = vpack.c.bf16 %v311_v23, %v310_v22  ;;  %v333_v29 = vld [vmem:[%s1566_s10 + $0xd8] sm:$0xff] }
  0x1c   : > { %445 = vmatpush.bf16.msra.mxu0 %v1307_v2  ;;  %1346 = vmatpush.bf16.msra.mxu2 %v1307_v2  ;;  %v346_v27 = vpack.c.bf16 %v323_v25, %v322_v24  ;;  %v351_v30 = vpack.c.bf16 %v333_v29, %v332_v28  ;;  %v312_v31 = vld [vmem:[%s1566_s10 + $0x30] sm:$0xff]  ;;  %v313_v32 = vld [vmem:[%s1566_s10 + $0x38] sm:$0xff]  ;;  %v334_v37 = vld [vmem:[%s1566_s10 + $0xe0] sm:$0xff] }
  0x1d   : > { %1347 = vmatpush.bf16.msra.mxu3 %v1307_v2  ;;  %v324_v33 = vld [vmem:[%s1566_s10 + $0x90] sm:$0xff]  ;;  %v325_v34 = vld [vmem:[%s1566_s10 + $0x98] sm:$0xff]  ;;  %v341_v35 = vpack.c.bf16 %v313_v32, %v312_v31  ;;  %v335_v38 = vld [vmem:[%s1566_s10 + $0xe8] sm:$0xff] }
  0x1e   : > { %v347_v36 = vpack.c.bf16 %v325_v34, %v324_v33  ;;  %v352_v39 = vpack.c.bf16 %v335_v38, %v334_v37  ;;  %v314_v40 = vld [vmem:[%s1566_s10 + $0x40] sm:$0xff]  ;;  %v315_v41 = vld [vmem:[%s1566_s10 + $0x48] sm:$0xff]  ;;  %v336_v46 = vld [vmem:[%s1566_s10 + $0xf0] sm:$0xff] }
  0x1f   : > { %v326_v42 = vld [vmem:[%s1566_s10 + $0xa0] sm:$0xff]  ;;  %v327_v43 = vld [vmem:[%s1566_s10 + $0xa8] sm:$0xff]  ;;  %v342_v44 = vpack.c.bf16 %v315_v41, %v314_v40  ;;  %v337_v47 = vld [vmem:[%s1566_s10 + $0xf8] sm:$0xff] }
  0x20   : > { %446 = vmatpush.bf16.msra.mxu0 %v1306_v3  ;;  %1348 = vmatpush.bf16.msra.mxu2 %v1306_v3  ;;  %v348_v45 = vpack.c.bf16 %v327_v43, %v326_v42  ;;  %v353_v48 = vpack.c.bf16 %v337_v47, %v336_v46  ;;  %v316_v49 = vld [vmem:[%s1566_s10 + $0x50] sm:$0xff]  ;;  %v317_v50 = vld [vmem:[%s1566_s10 + $0x58] sm:$0xff]  ;;  %v1637_v4 = vld [vmem:[%s1963_s2] ss:$0 sm:$0xff] }
  0x21   : > { %1349 = vmatpush.bf16.msra.mxu3 %v1306_v3  ;;  %v343_v51 = vpack.c.bf16 %v317_v50, %v316_v49  ;;  %v1324_v3 = vld [vmem:[%s1964_s3 + $0x74] sm:$0xf]  ;;  %v1236_v5 = vld [vmem:[%s1964_s3 + $0x78] sm:$0xf0] }
  0x22   : > { %v1239_v10 = vor.u32 %v1324_v3, %v1236_v5 }
  0x23   : > { %1160 = vmatmul.msk.bf16.vlgmr.msra.gmra.mxu0 %vm390_vm0, %v338_v8  ;;  %1166 = vmatmul.msk.bf16.vlgmr.msra.gmra.mxu2 %vm390_vm0, %v344_v9 }
  0x24   : > { %1171 = vmatmul.msk.bf16.vlgmr.msra.gmra.mxu3 %vm390_vm0, %v349_v12  ;;  %836 = vmatpush.bf16.msrb.mxu2 %v1239_v10 }
  0x33   : > { %1161 = vmatmul.msk.bf16.gmra.mxu0 %vm390_vm0, %v339_v17  ;;  %1167 = vmatmul.msk.bf16.gmra.mxu2 %vm390_vm0, %v345_v18 }
  0x34   : > { %1172 = vmatmul.msk.bf16.gmra.mxu3 %vm390_vm0, %v350_v21 }
  0x43   : > { %1162 = vmatmul.msk.bf16.gmra.mxu0 %vm390_vm0, %v340_v26  ;;  %1168 = vmatmul.msk.bf16.gmra.mxu2 %vm390_vm0, %v346_v27 }
  0x44   : > { %1173 = vmatmul.msk.bf16.gmra.mxu3 %vm390_vm0, %v351_v30 }
  0x53   : > { %1163 = vmatmul.msk.bf16.gmra.mxu0 %vm390_vm0, %v341_v35  ;;  %1169 = vmatmul.msk.bf16.gmra.mxu2 %vm390_vm0, %v347_v36 }
  0x54   : > { %1174 = vmatmul.msk.bf16.gmra.mxu3 %vm390_vm0, %v352_v39 }
  0x63   : > { %1164 = vmatmul.msk.bf16.gmra.mxu0 %vm390_vm0, %v342_v44  ;;  %1170 = vmatmul.msk.bf16.gmra.mxu2 %vm390_vm0, %v348_v45 }
  0x64   : > { %1175 = vmatmul.msk.bf16.gmra.mxu3 %vm390_vm0, %v353_v48 }
  0x73   : > { %1165 = vmatmul.msk.bf16.gmra.mxu0 %vm390_vm0, %v343_v51 }
  0xa0   : > { %v448_v52 = vpop.f32.mrf.mxu0 }
  0xa1   : > { %v449_v11 = vadd.f32 %v1637_v4, %v448_v52 }
  0xa3   : > { %v528_v15 = vadd.f32 3.0, %v449_v11 }
  0xa5   : > { %v560_v22 = vmax.f32 %v528_v15, 0.0 }
  0xa6   : > { %v478_v53 = vpop.f32.mrf.mxu2 }
  0xa7   : > { %v1619_v58 = vpop.f32.mrf.mxu3  ;;  %v592_v32 = vmin.f32 %v560_v22, 6.0  ;;  %v479_v34 = vadd.f32 %v1637_v4, %v478_v53 }
  0xa8   : > { %v450_v54 = vpop.f32.mrf.mxu0 }
  0xa9   : > { %v451_v7 = vadd.f32 %v1637_v4, %v450_v54  ;;  %v624_v44 = vmul.f32 %v592_v32, %v449_v11  ;;  %v540_v46 = vadd.f32 3.0, %v479_v34 }
  0xab   : > { %v529_v13 = vadd.f32 3.0, %v451_v7  ;;  %v656_v3 = vmul.f32 0.16666667, %v624_v44 }
  0xad   : > { %v561_v18 = vmax.f32 %v529_v13, 0.0 }
  0xae   : > { %v480_v56 = vpop.f32.mrf.mxu2 }
  0xaf   : > { %v1623_v61 = vpop.f32.mrf.mxu3  ;;  %v593_v28 = vmin.f32 %v561_v18, 6.0  ;;  %v1664_v52 = vadd.f32 %v1637_v4, %v480_v56  ;;  %v572_v56 = vmax.f32 %v540_v46, 0.0 }
  0xb0   : > { %v453_v55 = vpop.f32.mrf.mxu0 }
  0xb1   : > { %v454_v12 = vadd.f32 %v1637_v4, %v453_v55  ;;  %v625_v38 = vmul.f32 %v593_v28, %v451_v7 }
  0xb3   : > { %v530_v16 = vadd.f32 3.0, %v454_v12  ;;  %v657_v50 = vmul.f32 0.16666667, %v625_v38 }
  0xb5   : > { %v562_v23 = vmax.f32 %v530_v16, 0.0 }
  0xb6   : > { %v1621_v59 = vpop.f32.mrf.mxu2 }
  0xb7   : > { %v1627_v0 = vpop.f32.mrf.mxu3  ;;  %v594_v33 = vmin.f32 %v562_v23, 6.0  ;;  %v604_v23 = vmin.f32 %v572_v56, 6.0 }
  0xb8   : > { %v455_v57 = vpop.f32.mrf.mxu0 }
  0xb9   : > { %v456_v14 = vadd.f32 %v1637_v4, %v455_v57  ;;  %v626_v45 = vmul.f32 %v594_v33, %v454_v12  ;;  %v688_v12 = vadd.f32 %v657_v50, %v656_v3 }
  0xbb   : > { %v531_v19 = vadd.f32 3.0, %v456_v14  ;;  %v658_v5 = vmul.f32 0.16666667, %v626_v45 }
  0xbd   : > { %v563_v29 = vmax.f32 %v531_v19, 0.0  ;;  %v689_v22 = vadd.f32 %v688_v12, %v658_v5 }
  0xbe   : > { %v1625_v62 = vpop.f32.mrf.mxu2 }
  0xbf   : > { %v1642_v6 = vpop.f32.mrf.mxu3  ;;  %v595_v39 = vmin.f32 %v563_v29, 6.0 }
  0xc0   : > { %v458_v60 = vpop.f32.mrf.mxu0 }
  0xc1   : > { %v459_v17 = vadd.f32 %v1637_v4, %v458_v60  ;;  %v627_v51 = vmul.f32 %v595_v39, %v456_v14  ;;  %v541_v14 = vadd.f32 3.0, %v1664_v52 }
  0xc3   : > { %v532_v26 = vadd.f32 3.0, %v459_v17  ;;  %v659_v13 = vmul.f32 0.16666667, %v627_v51  ;;  %v573_v33 = vmax.f32 %v541_v14, 0.0 }
  0xc5   : > { %v564_v35 = vmax.f32 %v532_v26, 0.0  ;;  %v1681_v26 = vadd.f32 %v1637_v4, %v1621_v59  ;;  %v690_v32 = vadd.f32 %v689_v22, %v659_v13  ;;  %v636_v59 = vmul.f32 %v604_v23, %v479_v34 }
  0xc6   : > { %v1629_v1 = vpop.f32.mrf.mxu2 }
  0xc7   : > { %v1654_v25 = vpop.f32.mrf.mxu3  ;;  %v596_v47 = vmin.f32 %v564_v35, 6.0  ;;  %v1685_v35 = vadd.f32 %v1637_v4, %v1619_v58  ;;  %v1702_v34 = vadd.f32 %v1637_v4, %v1629_v1 }
  0xc8   : > { %v460_v63 = vpop.f32.mrf.mxu0 }
  0xc9   : > { %v461_v20 = vadd.f32 %v1637_v4, %v460_v63  ;;  %v1322_v63 = vld [vmem:[%s1964_s3 + $0x64] sm:$0xf] }
  0xcb   : > { %v533_v30 = vadd.f32 3.0, %v461_v20 }
  0xcd   : > { %v565_v40 = vmax.f32 %v533_v30, 0.0 }
  0xce   : > { %v1645_v9 = vpop.f32.mrf.mxu2 }
  0xcf   : > { %v597_v53 = vmin.f32 %v565_v40, 6.0  ;;  %v1668_v55 = vpop.f32.mrf.mxu3 }
  0xd0   : > { %v463_v2 = vpop.f32.mrf.mxu0 }
  0xd1   : > { %v464_v27 = vadd.f32 %v1637_v4, %v463_v2  ;;  %v1228_v2 = vld [vmem:[%s1964_s3 + $0x68] sm:$0xf0]  ;;  %v629_v16 = vmul.f32 %v597_v53, %v461_v20  ;;  %v1689_v20 = vadd.f32 %v1637_v4, %v1623_v61  ;;  %v605_v61 = vmin.f32 %v573_v33, 6.0 }
  0xd2   : > { %v1231_v7 = vor.u32 %v1322_v63, %v1228_v2  ;;  %v1709_v63 = vadd.f32 %v1637_v4, %v1645_v9  ;;  %v1234_v9 = vld [vmem:[%s1964_s3 + $0x70] sm:$0xf] }
  0xd3   : > { %v534_v36 = vadd.f32 3.0, %v464_v27  ;;  %v637_v56 = vmul.f32 %v605_v61, %v1664_v52 }
  0xd4   : > { %837 = vmatpush.bf16.msrb.mxu2 %v1231_v7 }
  0xd5   : > { %v566_v48 = vmax.f32 %v534_v36, 0.0  ;;  %v661_v36 = vmul.f32 0.16666667, %v629_v16  ;;  %v545_v16 = vadd.f32 3.0, %v1709_v63  ;;  %v669_v23 = vmul.f32 0.16666667, %v637_v56 }
  0xd6   : > { %v1652_v24 = vpop.f32.mrf.mxu2 }
  0xd7   : > { %v598_v10 = vmin.f32 %v566_v48, 6.0  ;;  %v1696_v44 = vpop.f32.mrf.mxu3  ;;  %v550_v48 = vadd.f32 3.0, %v1685_v35 }
  0xd8   : > { %v465_v8 = vpop.f32.mrf.mxu0 }
  0xd9   : > { %v466_v31 = vadd.f32 %v1637_v4, %v465_v8  ;;  %v628_v8 = vmul.f32 %v596_v47, %v459_v17  ;;  %v630_v28 = vmul.f32 %v598_v10, %v464_v27  ;;  %v1694_v27 = vadd.f32 %v1637_v4, %v1625_v62 }
  0xda   : > { %v582_v7 = vmax.f32 %v550_v48, 0.0 }
  0xdb   : > { %v535_v42 = vadd.f32 3.0, %v466_v31  ;;  %v660_v17 = vmul.f32 0.16666667, %v628_v8  ;;  %v662_v45 = vmul.f32 0.16666667, %v630_v28  ;;  %v544_v8 = vadd.f32 3.0, %v1702_v34 }
  0xdd   : > { %v567_v57 = vmax.f32 %v535_v42, 0.0  ;;  %v691_v58 = vadd.f32 %v690_v32, %v660_v17  ;;  %v576_v17 = vmax.f32 %v544_v8, 0.0 }
  0xde   : > { %v1666_v54 = vpop.f32.mrf.mxu2 }
  0xdf   : > { %v599_v18 = vmin.f32 %v567_v57, 6.0  ;;  %v692_v50 = vadd.f32 %v691_v58, %v661_v36  ;;  %v668_v57 = vmul.f32 0.16666667, %v636_v59  ;;  %v1723_v52 = vadd.f32 %v1637_v4, %v1666_v54  ;;  %v1732_v32 = vpop.f32.mrf.mxu3 }
  0xe0   : > { %v468_v21 = vpop.f32.mrf.mxu0  ;;  %v1734_v54 = vmin.f32 %v582_v7, 6.0  ;;  %v608_v48 = vmin.f32 %v576_v17, 6.0 }
  0xe1   : > { %v469_v37 = vadd.f32 %v1637_v4, %v468_v21  ;;  %v631_v38 = vmul.f32 %v599_v18, %v466_v31  ;;  %v551_v31 = vadd.f32 3.0, %v1689_v20  ;;  %v693_v2 = vadd.f32 %v692_v50, %v662_v45 }
  0xe2   : > { %v547_v58 = vadd.f32 3.0, %v1723_v52  ;;  %v640_v8 = vmul.f32 %v608_v48, %v1702_v34  ;;  %v1210_v34 = vld [vmem:[%s1964_s3 + $0x40] sm:$0xf] }
  0xe3   : > { %v536_v49 = vadd.f32 3.0, %v469_v37  ;;  %v663_v62 = vmul.f32 0.16666667, %v631_v38  ;;  %v583_v10 = vmax.f32 %v551_v31, 0.0  ;;  %v1226_v38 = vld [vmem:[%s1964_s3 + $0x60] sm:$0xf] }
  0xe5   : > { %v568_v11 = vmax.f32 %v536_v49, 0.0  ;;  %v1747_v61 = vmin.f32 %v583_v10, 6.0  ;;  %v1767_v10 = vadd.f32 %v1637_v4, %v1627_v0 }
  0xe6   : > { %v498_v42 = vpop.f32.mrf.mxu2 }
  0xe7   : > { %v600_v29 = vmin.f32 %v568_v11, 6.0  ;;  %v694_v11 = vadd.f32 %v693_v2, %v663_v62  ;;  %v1220_v62 = vld [vmem:[%s1964_s3 + $0x58] sm:$0xf0]  ;;  %v552_v17 = vadd.f32 3.0, %v1767_v10 }
  0xe8   : > { %v470_v41 = vpop.f32.mrf.mxu0 }
  0xe9   : > { %v1661_v43 = vadd.f32 %v1637_v4, %v470_v41  ;;  %v542_v41 = vadd.f32 3.0, %v1681_v26  ;;  %v632_v46 = vmul.f32 %v600_v29, %v469_v37  ;;  %v543_v37 = vadd.f32 3.0, %v1694_v27 }
  0xea   : > { %v1730_v29 = vadd.f32 %v1637_v4, %v498_v42 }
  0xeb   : > { %v537_v60 = vadd.f32 3.0, %v1661_v43  ;;  %v664_v3 = vmul.f32 0.16666667, %v632_v46 }
  0xed   : > { %v569_v19 = vmax.f32 %v537_v60, 0.0  ;;  %v574_v60 = vmax.f32 %v542_v41, 0.0  ;;  %v695_v18 = vadd.f32 %v694_v11, %v664_v3  ;;  %v577_v41 = vmax.f32 %v545_v16, 0.0  ;;  %v1321_v3 = vld [vmem:[%s1964_s3 + $0x54] sm:$0xf0] }
  0xef   : > { %v601_v39 = vmin.f32 %v569_v19, 6.0  ;;  %v606_v14 = vmin.f32 %v574_v60, 6.0 }
  0xf0   : > { %v473_v15 = vpop.f32.mrf.mxu0 }
  0xf1   : > { %v474_v21 = vadd.f32 %v1637_v4, %v473_v15  ;;  %v633_v51 = vmul.f32 %v601_v39, %v1661_v43  ;;  %v1715_v43 = vadd.f32 %v1637_v4, %v1652_v24  ;;  %v575_v15 = vmax.f32 %v543_v37, 0.0  ;;  %v1325_v24 = vld [vmem:[%s1964_s3 + $0x74] sm:$0xf0]  ;;  %v1323_v39 = vld [vmem:[%s1964_s3 + $0x64] sm:$0xf0] }
  0xf2   : > { %v1235_v22 = vor.u32 %v1325_v24, %v1234_v9  ;;  %v1227_v42 = vor.u32 %v1323_v39, %v1226_v38  ;;  %v609_v37 = vmin.f32 %v577_v41, 6.0  ;;  %v1319_v24 = vld [vmem:[%s1964_s3 + $0x44] sm:$0xf0]  ;;  %v1202_v38 = vld [vmem:[%s1964_s3 + $0x30] sm:$0xf] }
  0xf3   : > { %v538_v30 = vadd.f32 3.0, %v474_v21  ;;  %v665_v12 = vmul.f32 0.16666667, %v633_v51  ;;  %v546_v28 = vadd.f32 3.0, %v1715_v43  ;;  %v607_v59 = vmin.f32 %v575_v15, 6.0  ;;  %v523_v15 = vpop.f32.mrf.mxu3 }
  0xf4   : > { %823 = vmatpush.bf16.msra.mxu1 %v1235_v22  ;;  %v1218_v51 = vld [vmem:[%s1964_s3 + $0x50] sm:$0xf]  ;;  %v641_v0 = vmul.f32 %v609_v37, %v1709_v63  ;;  %v1211_v22 = vor.u32 %v1319_v24, %v1210_v34  ;;  %v1789_v63 = vadd.f32 %v1637_v4, %v1654_v25 }
  0xf5   : > { %v570_v40 = vmax.f32 %v538_v30, 0.0  ;;  %v500_v30 = vpop.f32.mrf.mxu2  ;;  %v696_v33 = vadd.f32 %v695_v18, %v665_v12  ;;  %v578_v31 = vmax.f32 %v546_v28, 0.0  ;;  %v639_v60 = vmul.f32 %v607_v59, %v1694_v27  ;;  %v1317_v59 = vld [vmem:[%s1964_s3 + $0x34] sm:$0xf0] }
  0xf6   : > { %v1219_v7 = vor.u32 %v1321_v3, %v1218_v51  ;;  %v673_v25 = vmul.f32 0.16666667, %v641_v0  ;;  %v1203_v48 = vor.u32 %v1317_v59, %v1202_v38 }
  0xf7   : > { %v602_v47 = vmin.f32 %v570_v40, 6.0  ;;  %v638_v40 = vmul.f32 %v606_v14, %v1681_v26  ;;  %v1320_v26 = vld [vmem:[%s1964_s3 + $0x54] sm:$0xf]  ;;  %v610_v11 = vmin.f32 %v578_v31, 6.0  ;;  %v671_v9 = vmul.f32 0.16666667, %v639_v60 }
  0xf8   : > { %v475_v49 = vpop.f32.mrf.mxu0  ;;  %824 = vmatpush.bf16.msra.mxu1 %v1227_v42  ;;  %v1223_v2 = vor.u32 %v1320_v26, %v1220_v62  ;;  %v1781_v14 = vadd.f32 %v1637_v4, %v1642_v6  ;;  %v554_v31 = vadd.f32 3.0, %v1789_v63  ;;  %v1315_v26 = vld [vmem:[%s1964_s3 + $0x24] sm:$0xf0]  ;;  %v1312_v60 = vld [vmem:[%s1964_s3 + $0x14] sm:$0xf] }
  0xf9   : > { %v476_v53 = vadd.f32 %v1637_v4, %v475_v49  ;;  %v634_v5 = vmul.f32 %v602_v47, %v474_v21  ;;  %v1745_v47 = vadd.f32 %v1637_v4, %v500_v30  ;;  %v548_v49 = vadd.f32 3.0, %v1730_v29 }
  0xfa   : > { %838 = vmatpush.bf16.msrb.mxu2 %v1223_v2  ;;  %v642_v6 = vmul.f32 %v610_v11, %v1715_v43  ;;  %v553_v39 = vadd.f32 3.0, %v1781_v14  ;;  %v1804_v43 = vadd.f32 %v1637_v4, %v1668_v55  ;;  %v584_v55 = vmax.f32 %v552_v17, 0.0 }
  0xfb   : > { %v539_v1 = vadd.f32 3.0, %v476_v53  ;;  %v666_v19 = vmul.f32 0.16666667, %v634_v5  ;;  %v579_v5 = vmax.f32 %v547_v58, 0.0  ;;  %v549_v56 = vadd.f32 3.0, %v1745_v47 }
  0xfc   : > { %v580_v12 = vmax.f32 %v548_v49, 0.0  ;;  %825 = vmatpush.bf16.msra.mxu1 %v1219_v7  ;;  %v1819_v49 = vadd.f32 %v1637_v4, %v1696_v44  ;;  %v674_v62 = vmul.f32 0.16666667, %v642_v6  ;;  %v1188_v44 = vld [vmem:[%s1964_s3 + $0x18] sm:$0xf0]  ;;  %v646_v2 = vmul.f32 %v1734_v54, %v1685_v35 }
  0xfd   : > { %v571_v13 = vmax.f32 %v539_v1, 0.0  ;;  %v697_v45 = vadd.f32 %v696_v33, %v666_v19  ;;  %v611_v18 = vmin.f32 %v579_v5, 6.0  ;;  %v1316_v33 = vld [vmem:[%s1964_s3 + $0x34] sm:$0xf]  ;;  %v585_v3 = vmax.f32 %v553_v39, 0.0 }
  0xfe   : > { %v612_v28 = vmin.f32 %v580_v12, 6.0  ;;  %v555_v5 = vadd.f32 3.0, %v1804_v43  ;;  %v521_v11 = vadd.f32 %v1637_v4, %v1732_v32  ;;  %v616_v12 = vmin.f32 %v584_v55, 6.0  ;;  %v1180_v32 = vld [vmem:[%s1964_s3 + $0x8] sm:$0xf0] }
  0xff   : > { %v603_v21 = vmin.f32 %v571_v13, 6.0  ;;  %v1318_v13 = vld [vmem:[%s1964_s3 + $0x44] sm:$0xf]  ;;  %v643_v41 = vmul.f32 %v611_v18, %v1723_v52  ;;  %v586_v35 = vmax.f32 %v554_v31, 0.0  ;;  %v556_v54 = vadd.f32 3.0, %v1819_v49 }
 0x100   : > { %826 = vmatpush.bf16.msra.mxu1 %v1211_v22  ;;  %v644_v51 = vmul.f32 %v612_v28, %v1730_v29  ;;  %v1186_v29 = vld [vmem:[%s1964_s3 + $0x10] sm:$0xf]  ;;  %v617_v24 = vmin.f32 %v585_v3, 6.0  ;;  %v587_v18 = vmax.f32 %v555_v5, 0.0  ;;  %v678_v28 = vmul.f32 0.16666667, %v646_v2 }
 0x101   : > { %v635_v36 = vmul.f32 %v603_v21, %v476_v53  ;;  %v670_v53 = vmul.f32 0.16666667, %v638_v40  ;;  %v581_v21 = vmax.f32 %v549_v56, 0.0  ;;  %v675_v56 = vmul.f32 0.16666667, %v643_v41 }
 0x102   : > { %v648_v6 = vmul.f32 %v616_v12, %v1767_v10  ;;  %v649_v39 = vmul.f32 %v617_v24, %v1781_v14 }
 0x103   : > { %v667_v46 = vmul.f32 0.16666667, %v635_v36  ;;  %v1204_v36 = vld [vmem:[%s1964_s3 + $0x38] sm:$0xf0]  ;;  %v613_v42 = vmin.f32 %v581_v21, 6.0 }
 0x104   : > { %v1207_v40 = vor.u32 %v1316_v33, %v1204_v36  ;;  %827 = vmatpush.bf16.msra.mxu1 %v1203_v48  ;;  %v681_v48 = vmul.f32 0.16666667, %v649_v39 }
 0x105   : > { %v698_v50 = vadd.f32 %v697_v45, %v667_v46  ;;  %v1314_v45 = vld [vmem:[%s1964_s3 + $0x24] sm:$0xf]  ;;  %v1196_v46 = vld [vmem:[%s1964_s3 + $0x28] sm:$0xf0]  ;;  %v645_v7 = vmul.f32 %v613_v42, %v1745_v47 }
 0x106   : > { %v1199_v52 = vor.u32 %v1314_v45, %v1196_v46  ;;  %v1310_v47 = vld [vmem:[%s1964_s3 + $0x4] sm:$0xf] }
 0x107   : > { %v699_v1 = vadd.f32 %v698_v50, %v668_v57  ;;  %v1212_v57 = vld [vmem:[%s1964_s3 + $0x48] sm:$0xf0]  ;;  %v1194_v50 = vld [vmem:[%s1964_s3 + $0x20] sm:$0xf]  ;;  %v677_v21 = vmul.f32 0.16666667, %v645_v7 }
 0x108   : > { %v1215_v16 = vor.u32 %v1318_v13, %v1212_v57  ;;  %v1195_v37 = vor.u32 %v1315_v26, %v1194_v50  ;;  %v1191_v13 = vor.u32 %v1312_v60, %v1188_v44  ;;  %v676_v57 = vmul.f32 0.16666667, %v644_v51 }
 0x109   : > { %v700_v27 = vadd.f32 %v699_v1, %v669_v23  ;;  %v672_v23 = vmul.f32 0.16666667, %v640_v8  ;;  %v1313_v1 = vld [vmem:[%s1964_s3 + $0x14] sm:$0xf0] }
 0x10a   : > { %839 = vmatpush.bf16.msrb.mxu2 %v1215_v16  ;;  %828 = vmatpush.bf16.msra.mxu1 %v1195_v37  ;;  %v1187_v0 = vor.u32 %v1313_v1, %v1186_v29  ;;  %v647_v16 = vmul.f32 %v1747_v61, %v1689_v20  ;;  %v1183_v20 = vor.u32 %v1310_v47, %v1180_v32  ;;  %v588_v61 = vmax.f32 %v556_v54, 0.0 }
 0x10b   : > { %v701_v19 = vadd.f32 %v700_v27, %v670_v53  ;;  %v525_v27 = vpop.f32.mrf.mxu3 }
 0x10c   : > { %v526_v17 = vadd.f32 %v1637_v4, %v525_v27  ;;  %v620_v10 = vmin.f32 %v588_v61, 6.0 }
 0x10d   : > { %v702_v30 = vadd.f32 %v701_v19, %v671_v9  ;;  %v524_v9 = vadd.f32 %v1637_v4, %v523_v15  ;;  %v1178_v19 = vld [vmem:[%s1964_s3] sm:$0xf]  ;;  %v1311_v15 = vld [vmem:[%s1964_s3 + $0x4] sm:$0xf0] }
 0x10e   : > { %840 = vmatpush.bf16.msrb.mxu2 %v1207_v40  ;;  %829 = vmatpush.bf16.msra.mxu1 %v1187_v0  ;;  %v1179_v38 = vor.u32 %v1311_v15, %v1178_v19  ;;  %v619_v40 = vmin.f32 %v587_v18, 6.0  ;;  %v559_v42 = vadd.f32 3.0, %v526_v17  ;;  %v652_v14 = vmul.f32 %v620_v10, %v1819_v49  ;;  %v1333_v15 = vld [vmem:[%s1967_s6 + $0x38] sm:$0xff]  ;;  %v1339_v10 = vld [vmem:[%s1967_s6 + $0x68] sm:$0xff] }
 0x10f   : > { %v703_v58 = vadd.f32 %v702_v30, %v672_v23  ;;  %v557_v23 = vadd.f32 3.0, %v521_v11  ;;  %v618_v30 = vmin.f32 %v586_v35, 6.0  ;;  %v558_v36 = vadd.f32 3.0, %v524_v9  ;;  %1043 = vmatpush.bf16.msrb.mxu3 %v1333_v15 }
 0x110   : > { %v651_v55 = vmul.f32 %v619_v40, %v1804_v43  ;;  %v591_v50 = vmax.f32 %v559_v42, 0.0  ;;  %v1459_v19 = vmov 256.0  }
 0x111   : > { %v704_v53 = vadd.f32 %v703_v58, %v673_v25  ;;  %v679_v25 = vmul.f32 0.16666667, %v647_v16  ;;  %v589_v41 = vmax.f32 %v557_v23, 0.0  ;;  %v680_v58 = vmul.f32 0.16666667, %v648_v6  ;;  %v1330_v6 = vld [vmem:[%s1967_s6 + $0x20] sm:$0xff] }
 0x112   : > { %841 = vmatpush.bf16.msrb.mxu2 %v1199_v52  ;;  %v650_v4 = vmul.f32 %v618_v30, %v1789_v63  ;;  %v590_v46 = vmax.f32 %v558_v36, 0.0  ;;  %830 = vmatpush.bf16.msra.mxu1 %v1179_v38  ;;  %v623_v37 = vmin.f32 %v591_v50, 6.0  ;;  %v684_v63 = vmul.f32 0.16666667, %v652_v14  ;;  %v1335_v50 = vld [vmem:[%s1967_s6 + $0x48] sm:$0xff] }
 0x113   : > { %v705_v8 = vadd.f32 %v704_v53, %v674_v62  ;;  %v621_v52 = vmin.f32 %v589_v41, 6.0  ;;  %v683_v53 = vmul.f32 0.16666667, %v651_v55  ;;  %1391 = vrcp.f32 %v1459_v19  ;;  %v1328_v55 = vld [vmem:[%s1967_s6 + $0x10] sm:$0xff] }
 0x114   : > { %v682_v26 = vmul.f32 0.16666667, %v650_v4  ;;  %v622_v51 = vmin.f32 %v590_v46, 6.0  ;;  %v655_v1 = vmul.f32 %v623_v37, %v526_v17  ;;  %v1331_v17 = vld [vmem:[%s1967_s6 + $0x28] sm:$0xff]  ;;  %v1340_v4 = vld [vmem:[%s1967_s6 + $0x70] sm:$0xff]  ;;  %v1329_v46 = vld [vmem:[%s1967_s6 + $0x18] sm:$0xff] }
 0x115   : > { %v706_v34 = vadd.f32 %v705_v8, %v675_v56  ;;  %v653_v60 = vmul.f32 %v621_v52, %v521_v11  ;;  %v1327_v52 = vld [vmem:[%s1967_s6 + $0x8] sm:$0xff] }
 0x116   : > { %842 = vmatpush.bf16.msrb.mxu2 %v1191_v13  ;;  %v654_v3 = vmul.f32 %v622_v51, %v524_v9  ;;  %v687_v8 = vmul.f32 0.16666667, %v655_v1  ;;  %v1334_v51 = vld [vmem:[%s1967_s6 + $0x40] sm:$0xff] }
 0x117   : > { %v707_v22 = vadd.f32 %v706_v34, %v676_v57  ;;  %v685_v5 = vmul.f32 0.16666667, %v653_v60 }
 0x118   : > { %v686_v43 = vmul.f32 0.16666667, %v654_v3  ;;  %v886_v3 = vld [vmem:[%s1965_s4] sm:$0x3] }
 0x119   : > { %v708_v33 = vadd.f32 %v707_v22, %v677_v21  ;;  %v1392_v21 = vpop.eup %1391  ;;  %v1332_v22 = vld [vmem:[%s1967_s6 + $0x30] sm:$0xff]  ;;  %v888_v1 = vperm.slane %v886_v3, 0 }
 0x11a   : > { %843 = vmatpush.bf16.msrb.mxu2 %v1183_v20  ;;  %v856_v23 = vmul.f32 256.0, %v1392_v21  ;;  %1044 = vmatpush.bf16.msrb.mxu3 %v1332_v22  ;;  %vm860_vm2 = vweird.f32 %v1392_v21  ;;  %v946_v22 = vld [vmem:[%s1968_s7] sm:$0x1] }
 0x11b   : > { %v709_v59 = vadd.f32 %v708_v33, %v678_v28 }
 0x11c   : > { %v857_v28 = vsub.f32 1.0, %v856_v23 }
 0x11d   : > { %v710_v45 = vadd.f32 %v709_v59, %v679_v25 }
 0x11e   : > { %1045 = vmatpush.bf16.msrb.mxu3 %v1331_v17  ;;  %v858_v30 = vmul.f32 %v1392_v21, %v857_v28 }
 0x11f   : > { %v711_v31 = vadd.f32 %v710_v45, %v680_v58  ;;  %v1341_v58 = vld [vmem:[%s1967_s6 + $0x78] sm:$0xff]  ;;  %v1338_v45 = vld [vmem:[%s1967_s6 + $0x60] sm:$0xff] }
 0x120   : > { %v859_v20 = vadd.f32 %v1392_v21, %v858_v30  ;;  %1056 = vmatpush.bf16.msrb.mxu1 %v1341_v58 }
 0x121   : > { %v712_v62 = vadd.f32 %v711_v31, %v681_v48  ;;  %v1337_v48 = vld [vmem:[%s1967_s6 + $0x58] sm:$0xff]  ;;  %v1336_v31 = vld [vmem:[%s1967_s6 + $0x50] sm:$0xff] }
 0x122   : > { %1046 = vmatpush.bf16.msrb.mxu3 %v1330_v6  ;;  %v861_v61 = vsel %vm860_vm2, %v1392_v21, %v859_v20 }
 0x123   : > { %v713_v44 = vadd.f32 %v712_v62, %v682_v26  ;;  %v1326_v62 = vld [vmem:[%s1967_s6] sm:$0xff] }
 0x124   : > { %1057 = vmatpush.bf16.msrb.mxu1 %v1340_v4 }
 0x125   : > { %v714_v2 = vadd.f32 %v713_v44, %v683_v53 }
 0x126   : > { %1047 = vmatpush.bf16.msrb.mxu3 %v1329_v46 }
 0x127   : > { %v715_v29 = vadd.f32 %v714_v2, %v684_v63 }
 0x128   : > { %1058 = vmatpush.bf16.msrb.mxu1 %v1339_v10 }
 0x129   : > { %v716_v56 = vadd.f32 %v715_v29, %v685_v5  ;;  %v894_v29 = vld [vmem:[%s1966_s5] sm:$0x3] }
 0x12a   : > { %1048 = vmatpush.bf16.msrb.mxu3 %v1328_v55 }
 0x12b   : > { %v717_v7 = vadd.f32 %v716_v56, %v686_v43  ;;  %v889_v56 = vperm.slane %v886_v3, 1 }
 0x12c   : > { %1059 = vmatpush.bf16.msrb.mxu1 %v1338_v45 }
 0x12d   : > { %v718_v12 = vadd.f32 %v717_v7, %v687_v8 }
 0x12e   : > { %1049 = vmatpush.bf16.msrb.mxu3 %v1327_v52 }
 0x12f   : > { %v719_v35 = vrot.slane %v718_v12, 4 }
 0x130   : > { %1060 = vmatpush.bf16.msrb.mxu1 %v1337_v48 }
 0x131   : > { %v720_v54 = vadd.f32 %v719_v35, %v718_v12  ;;  %v896_v12 = vperm.slane %v894_v29, 0  ;;  %v897_v35 = vperm.slane %v894_v29, 1 }
 0x132   : > { %1050 = vmatpush.bf16.msrb.mxu3 %v1326_v62 }
 0x133   : > { %v721_v49 = vrot.slane %v720_v54, 2 }
 0x134   : > { %1061 = vmatpush.bf16.msrb.mxu1 %v1336_v31 }
 0x135   : > { %v722_v27 = vadd.f32 %v721_v49, %v720_v54 }
 0x137   : > { %v723_v13 = vrot.slane %v722_v27, 1 }
 0x138   : > { %1062 = vmatpush.bf16.msrb.mxu1 %v1335_v50 }
 0x139   : > { %v724_v57 = vadd.f32 %v723_v13, %v722_v27 }
 0x13b   : > { %v725_v11 = vmul.f32 0.00390625, %v724_v57 }
 0x13c   : > { %1063 = vmatpush.bf16.msrb.mxu1 %v1334_v51 }
 0x13d   : > { %v726_v34 = vpack.c.bf16 %v725_v11, %v725_v11 }
 0x13f   : > { %831 = vmatmul.bf16.vlgmr.msra.gmra.mxu1 %v726_v34  ;;  %844 = vmatmul.bf16.vlgmr.msrb.gmra.mxu2 %v726_v34 }
 0x1bc   : > { %v832_v47 = vpop.f32.mrf.mxu1 }
 0x1bd   : > { %v850_v32 = vsel %vm849_vm1, %v832_v47, 0.0 }
 0x1c2   : > { %v845_v9 = vpop.f32.mrf.mxu2 }
 0x1c3   : > { %v851_v0 = vsel %vm849_vm1, %v845_v9, 0.0 }
 0x1c4   : > { %v834_v16 = vpop.f32.mrf.mxu1  ;;  %v852_v24 = vadd.f32 %v851_v0, %v850_v32 }
 0x1c6   : > { %853 = vadd.xlane.f32.xlu0 %v852_v24 }
 0x1ca   : > { %v847_v18 = vpop.f32.mrf.mxu2 }
 0x239   : > { %v854_v33 = vpop.xlane.xlu0 %853 }
 0x23a   : > { %v862_v36 = vmul.f32 %v861_v61, %v854_v33 }
 0x23c   : > { %v863_v38 = vsub.f32 %v832_v47, %v862_v36  ;;  %v864_v25 = vsub.f32 %v845_v9, %v862_v36 }
 0x23e   : > { %v865_v39 = vmul.f32 %v863_v38, %v863_v38  ;;  %v866_v40 = vmul.f32 %v864_v25, %v864_v25 }
 0x240   : > { %v867_v59 = vsel %vm849_vm1, %v865_v39, 0.0  ;;  %v868_v41 = vsel %vm849_vm1, %v866_v40, 0.0 }
 0x241   : > { %v869_v42 = vadd.f32 %v868_v41, %v867_v59 }
 0x243   : > { %870 = vadd.xlane.f32.xlu0 %v869_v42 }
 0x2b6   : > { %v871_v26 = vpop.xlane.xlu0 %870 }
 0x2b7   : > { %v872_v14 = vmul.f32 %v871_v26, %v861_v61 }
 0x2b9   : > { %v873_v53 = vadd.f32 1e-05, %v872_v14 }
 0x2bb   : > { %1393 = vrsqrt.f32 %v873_v53  ;;  %vm880_vm4 = vweird.f32 %v873_v53 }
 0x2c1   : > { %v1394_v60 = vpop.eup %1393 }
 0x2c2   : > { %v875_v44 = vmul.f32 %v1394_v60, %v873_v53  ;;  %vm881_vm3 = vweird.f32 %v1394_v60 }
 0x2c3   : > { %vm882_vm5 = vmor %vm880_vm4, %vm881_vm3 }
 0x2c4   : > { %v876_v37 = vmul.f32 %v1394_v60, %v875_v44 }
 0x2c6   : > { %v877_v63 = vmul.f32 0.5, %v876_v37 }
 0x2c8   : > { %v878_v2 = vsub.f32 1.5, %v877_v63 }
 0x2ca   : > { %v879_v5 = vmul.f32 %v1394_v60, %v878_v2 }
 0x2cc   : > { %v883_v43 = vsel %vm882_vm5, %v1394_v60, %v879_v5 }
 0x2cd   : > { %v884_v7 = vmul.f32 %v883_v43, %v863_v38  ;;  %v885_v8 = vmul.f32 %v883_v43, %v864_v25 }
 0x2cf   : > { %v892_v54 = vmul.f32 %v888_v1, %v884_v7  ;;  %v893_v49 = vmul.f32 %v889_v56, %v885_v8 }
 0x2d1   : > { %v900_v27 = vadd.f32 %v896_v12, %v892_v54  ;;  %v901_v13 = vadd.f32 %v897_v35, %v893_v49 }
 0x2d3   : > { %v902_v57 = vadd.f32 3.0, %v900_v27  ;;  %v903_v11 = vadd.f32 3.0, %v901_v13 }
 0x2d5   : > { %v904_v34 = vmax.f32 %v902_v57, 0.0  ;;  %v905_v47 = vmax.f32 %v903_v11, 0.0 }
 0x2d7   : > { %v906_v9 = vmin.f32 %v904_v34, 6.0  ;;  %v907_v32 = vmin.f32 %v905_v47, 6.0 }
 0x2d9   : > { %v908_v0 = vmul.f32 %v906_v9, %v900_v27  ;;  %v909_v16 = vmul.f32 %v907_v32, %v901_v13 }
 0x2db   : > { %v910_v24 = vmul.f32 0.16666667, %v908_v0  ;;  %v911_v18 = vmul.f32 0.16666667, %v909_v16 }
 0x2dd   : > { %v912_v19 = vpack.c.bf16 %v910_v24, %v910_v24  ;;  %v913_v15 = vpack.c.bf16 %v911_v18, %v911_v18 }
 0x2df   : > { %1051 = vmatmul.bf16.vlgmr.msrb.gmra.mxu3 %v912_v19  ;;  %1064 = vmatmul.bf16.vlgmr.msrb.gmra.mxu1 %v913_v15 }
 0x35c   : > { %v1065_v21 = vpop.f32.mrf.mxu1 }
 0x362   : > { %v1052_v23 = vpop.f32.mrf.mxu3 }
 0x363   : > { %v1053_v17 = vadd.f32 %v1052_v23, %v946_v22 }
 0x364   : > { %v1067_v28 = vpop.f32.mrf.mxu1 }
 0x365   : > { %v1066_v6 = vadd.f32 %v1065_v21, %v1053_v17 }
 0x367   : > { %1069 = vst [vmem:[%s298_s21] sm:$0x1] %v1066_v6 }
 0x368   : > { %1422 = shalt.err (!%p1419_p3)
}
 0x369   : > { %1350 = dma.vmem_to_hbm [thread:$0]  (%p1543_p5), %s1082_s22, 16, %s1084_s23, %s1071_s24  }
 0x36a   : > { %v1054_v30 = vpop.f32.mrf.mxu3 }
 0x36b PF: > { %p1356_p4 = scmp.ge.s32.totalorder %s1457_s30, 2  ;;  %s1095_s12 = sand.u32 1, %s1445_s27  }
 0x36c   : > { %s1096_s19 = scalar_lea.sflag [#allocation3], %s1095_s12 }
 0x36d   : > { %p1353_p7 = pnand %p1356_p4, %p1547_p6 }
 0x36f   : > { %p1354_p8 = pneg %p1353_p7 }
 0x371   : > { %1440 = dma.done.wait (%p1354_p8), %s1096_s19, 16  }
 0x372   : > { %1442 = vsyncadd (%p1354_p8), %s1096_s19, 4294967280  ;;  %p18_p9 = scmp.ge.s32.totalorder %s1530_s11, 4   ;;  %s1972_s27 = smov %s1449_s28 }
 0x373   : > { %s1973_s28 = smov %s1453_s29  ;;  %s1974_s29 = smov %s1541_s14 }
 0x374   : > { %s1975_s30 = smov %s1530_s11  ;;  %20 = sbr.rel (!%p18_p9) target bundleno = 3 (0x3), region = 87 }
 0x379   :  { %1101 = vsyncpa [#allocation3], 1 }
 0x37a   :  { %1103 = vsyncpa [#allocation3 + $0x1], 1 }

</bundles_post_ra>
